<compile_context>
chip_gen: v7x
topology: tpu7x:2x2x1
jax: 0.10.0
libtpu: 0.0.40
codegen_flags: <defaults>
</compile_context>

<pallas_src>
import functools

import jax
import jax.numpy as jnp
from jax.experimental import pallas as pl
from jax.experimental.pallas import tpu as pltpu

_TB_MAX = 2048                  # max batch-tile rows (bf16 x-tile ~3.7 MiB/buffer)
_COMPUTE_DTYPE = jnp.bfloat16   # MXU input dtype; accumulation stays float32
_VMEM_LIMIT = 32 * 1024 * 1024  # safe on v5e/v6e/v7x; ~10 MiB actually used


def _round_up(v, m):
    return (v + m - 1) // m * m


def _linear_kernel(x_ref, w_ref, b_ref, o_ref, *, apply_softmax):
    # MXU: (TB, K) @ (K, N) with f32 accumulation.  N = n_classes (small).
    logits = jnp.dot(
        x_ref[...], w_ref[...], preferred_element_type=jnp.float32
    ) + b_ref[...]

    if apply_softmax:
        m = jnp.max(logits, axis=-1, keepdims=True)   # XLU
        e = jnp.exp(logits - m)                        # EUP
        s = jnp.sum(e, axis=-1, keepdims=True)         # XLU
        out = e / s                                    # exact: rows sum to 1
    else:
        out = logits

    o_ref[...] = out.astype(o_ref.dtype)


def _linear(x, weight, bias, *, apply_softmax):
    B, n_features = x.shape
    n_classes = weight.shape[0]

    # Sublane-aligned batch tile, capped, and split >=2 ways when possible so
    # dimension_semantics=("parallel",) can shard across both v7x TensorCores.
    tb = min(_round_up(B, 8), _TB_MAX)
    tb = min(tb, max(8, _round_up((B + 1) // 2, 8)))
    grid = (pl.cdiv(B, tb),)

    x_c = x.astype(_COMPUTE_DTYPE)
    w_t = weight.T.astype(_COMPUTE_DTYPE)                   # (K, N), one-time copy
    b_2d = bias.astype(jnp.float32).reshape(1, n_classes)

    return pl.pallas_call(
        functools.partial(_linear_kernel, apply_softmax=apply_softmax),
        out_shape=jax.ShapeDtypeStruct((B, n_classes), jnp.float32),
        grid=grid,
        in_specs=[
            pl.BlockSpec((tb, n_features), lambda i: (i, 0)),          # x: streamed
            pl.BlockSpec((n_features, n_classes), lambda i: (0, 0)),   # W: resident
            pl.BlockSpec((1, n_classes), lambda i: (0, 0)),            # b: resident
        ],
        out_specs=pl.BlockSpec((tb, n_classes), lambda i: (i, 0)),
        compiler_params=pltpu.CompilerParams(
            dimension_semantics=("parallel",),
            vmem_limit_bytes=_VMEM_LIMIT,
        ),
    )(x_c, w_t, b_2d)


@jax.jit
def logistic_regression_forward(x, weight, bias):
    """fc1(x) == x @ weight.T + bias (PyTorch nn.Linear semantics)."""
    return _linear(x, weight, bias, apply_softmax=False)


@jax.jit
def predict(x, weight, bias):
    """F.softmax(fc1(x), dim=1) with the softmax fused into the Pallas kernel."""
    return _linear(x, weight, bias, apply_softmax=True)


def accuracy(x, weight, bias, y):
    # Argmax / compare done with plain jnp on the kernel output (10-wide argmax
    # is not worth an in-kernel implementation).
    pred = jnp.argmax(predict(x, weight, bias), axis=1)
    correct = jnp.sum(pred == y)
    acc = 100.0 * correct / y.shape[0]
    return acc, correct


if __name__ == "__main__":
    # MNIST-like but small: n_features=784 (28*28), n_classes=10, batch=8.
    B, n_features, n_classes = 8, 784, 10

    key = jax.random.PRNGKey(0)
    kx, kw, kb = jax.random.split(key, 3)

    # Deterministic init mimicking nn.Linear default: U(-1/sqrt(fan_in), ...)
    bound = 1.0 / (n_features ** 0.5)
    weight = jax.random.uniform(
        kw, (n_classes, n_features), jnp.float32, minval=-bound, maxval=bound
    )
    bias = jax.random.uniform(
        kb, (n_classes,), jnp.float32, minval=-bound, maxval=bound
    )
    x = jax.random.normal(kx, (B, n_features), jnp.float32)

    logits = jax.block_until_ready(logistic_regression_forward(x, weight, bias))
    probs = jax.block_until_ready(predict(x, weight, bias))

    # Reference with the same bf16 input rounding (kernel accumulates in f32).
    x_r = x.astype(jnp.bfloat16).astype(jnp.float32)
    w_r = weight.astype(jnp.bfloat16).astype(jnp.float32)
    ref_logits = x_r @ w_r.T + bias
    ref_probs = jax.nn.softmax(ref_logits, axis=1)

    assert logits.shape == (B, n_classes) and logits.dtype == jnp.float32
    assert probs.shape == (B, n_classes)
    err_l = float(jnp.max(jnp.abs(logits - ref_logits)))
    err_p = float(jnp.max(jnp.abs(probs - ref_probs)))
    assert jnp.allclose(logits, ref_logits, atol=2e-3, rtol=2e-3), err_l
    assert jnp.allclose(probs, ref_probs, atol=2e-3, rtol=2e-3), err_p
    assert jnp.allclose(jnp.sum(probs, axis=1), 1.0, atol=1e-3)

    # Accuracy helper sanity check: labels = reference argmax -> 100%.
    y = jnp.argmax(ref_probs, axis=1)
    acc, n_correct = accuracy(x, weight, bias, y)
    assert int(n_correct) == B and float(acc) == 100.0

    print("KERNEL_OK")
</pallas_src>

<mosaic_0001>
module attributes {stable_mosaic.version = 11 : i64} {
  func.func @_linear_kernel(%arg0: i32, %arg1: memref<8x784xbf16, #tpu.memory_space<vmem>>, %arg2: memref<784x10xbf16, #tpu.memory_space<vmem>>, %arg3: memref<1x10xf32, #tpu.memory_space<vmem>>, %arg4: memref<8x10xf32, #tpu.memory_space<vmem>>) attributes {dimension_semantics = [#tpu.dimension_semantics<parallel>], iteration_bounds = array<i64: 1>, scalar_prefetch = 0 : i64, scratch_operands = 0 : i64, tpu.core_type = #tpu.core_type<tc>, window_params = [{transform_indices = @transform_0, window_bounds = array<i64: 8, 784>}, {pipeline_mode = #tpu.pipeline_mode<synchronous>, transform_indices = @transform_1, window_bounds = array<i64: 784, 10>}, {pipeline_mode = #tpu.pipeline_mode<synchronous>, transform_indices = @transform_2, window_bounds = array<i64: 1, 10>}, {transform_indices = @transform_3, window_bounds = array<i64: 8, 10>}]} {
    %c0 = arith.constant 0 : index
    %c0_0 = arith.constant 0 : index
    %0 = vector.load %arg1[%c0, %c0_0] : memref<8x784xbf16, #tpu.memory_space<vmem>>, vector<8x784xbf16>
    %c0_1 = arith.constant 0 : index
    %c0_2 = arith.constant 0 : index
    %1 = vector.load %arg2[%c0_1, %c0_2] : memref<784x10xbf16, #tpu.memory_space<vmem>>, vector<784x10xbf16>
    %cst = arith.constant dense<0.000000e+00> : vector<8x10xf32>
    %2 = tpu.matmul %0, %1, %cst {dimension_numbers = #tpu.dot_dimension_numbers<[1], [0], [0], [1], [0, 0, 1, 1], [], []>} : vector<8x784xbf16>, vector<784x10xbf16>, vector<8x10xf32> -> vector<8x10xf32>
    %c0_3 = arith.constant 0 : index
    %c0_4 = arith.constant 0 : index
    %3 = vector.load %arg3[%c0_3, %c0_4] : memref<1x10xf32, #tpu.memory_space<vmem>>, vector<1x10xf32>
    %4 = vector.broadcast %3 : vector<1x10xf32> to vector<8x10xf32>
    %5 = arith.addf %2, %4 : vector<8x10xf32>
    %c0_5 = arith.constant 0 : index
    %c0_6 = arith.constant 0 : index
    %6 = vector.load %arg4[%c0_5, %c0_6] : memref<8x10xf32, #tpu.memory_space<vmem>>, vector<8x10xf32>
    tpu.vector_store %arg4[%c0_5, %c0_6], %5 {strides = array<i32>} : memref<8x10xf32, #tpu.memory_space<vmem>>, vector<8x10xf32>,
    return
  }
  func.func @transform_0(%arg0: i32) -> (i32, i32) {
    %c0_i32 = arith.constant 0 : i32
    %c0_i32_0 = arith.constant 0 : i32
    return %arg0, %c0_i32 : i32, i32
  }
  func.func @transform_1(%arg0: i32) -> (i32, i32) {
    %c0_i32 = arith.constant 0 : i32
    %c0_i32_0 = arith.constant 0 : i32
    %c0_i32_1 = arith.constant 0 : i32
    return %c0_i32, %c0_i32_0 : i32, i32
  }
  func.func @transform_2(%arg0: i32) -> (i32, i32) {
    %c0_i32 = arith.constant 0 : i32
    %c0_i32_0 = arith.constant 0 : i32
    %c0_i32_1 = arith.constant 0 : i32
    return %c0_i32, %c0_i32_0 : i32, i32
  }
  func.func @transform_3(%arg0: i32) -> (i32, i32) {
    %c0_i32 = arith.constant 0 : i32
    %c0_i32_0 = arith.constant 0 : i32
    return %arg0, %c0_i32 : i32, i32
  }
}

</mosaic_0001>

<bundles_post_ra>
// kernel: logistic_regression_forward.1
= control target key start
LH: loop header
LB: loop body
LE: loop exit
PB: predicated region body
PF: predicated region fallthrough
CT: control target
= control target key end

     0   :  { %v838_v43 = vmov 0.0   ;;  %vm839_vm0 = vmmov 0   ;;  %s1035_s0 = inlined_call_operand.vmem [shape: bf16[8,784], index: 0, kind: input, shape index: {}]   ;;  %s1036_s1 = inlined_call_operand.vmem [shape: bf16[784,10], index: 1, kind: input, shape index: {}]   ;;  %s1037_s2 = inlined_call_operand.vmem [shape: f32[1,10], index: 2, kind: input, shape index: {}]   ;;  %s1038_s3 = inlined_call_operand.hbm [shape: f32[8,10], index: 3, kind: output, shape index: {}]  }
   0x1   :  { %v758_v0 = vld [vmem:[%s1036_s1 + $0x40] sm:$0xff]   ;;  %v762_v4 = vld [vmem:[%s1036_s1 + $0x48] sm:$0xff]   ;;  %v766_v8 = vld [vmem:[%s1036_s1 + $0x50] sm:$0xff]  }
   0x2   :  { %v759_v1 = vld [vmem:[%s1036_s1] sm:$0xff]   ;;  %681 = vmatprep.subr.bf16.mxu0 %v758_v0  ;;  %v763_v5 = vld [vmem:[%s1036_s1 + $0x8] sm:$0xff]   ;;  %v767_v9 = vld [vmem:[%s1036_s1 + $0x10] sm:$0xff]  }
   0x3   :  { %v760_v2 = vld [vmem:[%s1036_s1 + $0xc0] sm:$0xff]   ;;  %682 = vmatpush3.bf16.msra.mxu0 %v759_v1  ;;  %v764_v6 = vld [vmem:[%s1036_s1 + $0xc8] sm:$0xff]   ;;  %v768_v10 = vld [vmem:[%s1036_s1 + $0xd0] sm:$0xff]  }
   0x4   :  { %v761_v3 = vld [vmem:[%s1036_s1 + $0x80] sm:$0xff]   ;;  %703 = vmatprep.subr.bf16.mxu1 %v760_v2  ;;  %683 = vmatprep.subr.bf16.mxu0 %v762_v4  ;;  %v765_v7 = vld [vmem:[%s1036_s1 + $0x88] sm:$0xff]   ;;  %v769_v11 = vld [vmem:[%s1036_s1 + $0x90] sm:$0xff]  }
   0x5   :  { %704 = vmatpush3.bf16.msra.mxu1 %v761_v3  ;;  %v770_v12 = vld [vmem:[%s1036_s1 + $0x58] sm:$0xff]   ;;  %v774_v16 = vld [vmem:[%s1036_s1 + $0x60] sm:$0xff]   ;;  %v778_v20 = vld [vmem:[%s1036_s1 + $0x68] sm:$0xff]  }
   0x6   :  { %705 = vmatprep.subr.bf16.mxu1 %v764_v6  ;;  %v771_v13 = vld [vmem:[%s1036_s1 + $0x18] sm:$0xff]   ;;  %v775_v17 = vld [vmem:[%s1036_s1 + $0x20] sm:$0xff]   ;;  %v779_v21 = vld [vmem:[%s1036_s1 + $0x28] sm:$0xff]  }
   0x7   :  { %684 = vmatpush3.bf16.msra.mxu0 %v763_v5  ;;  %v772_v14 = vld [vmem:[%s1036_s1 + $0xd8] sm:$0xff]   ;;  %v776_v18 = vld [vmem:[%s1036_s1 + $0xe0] sm:$0xff]   ;;  %v780_v22 = vld [vmem:[%s1036_s1 + $0xe8] sm:$0xff]  }
   0x8   :  { %685 = vmatprep.subr.bf16.mxu0 %v766_v8  ;;  %v773_v15 = vld [vmem:[%s1036_s1 + $0x98] sm:$0xff]   ;;  %v777_v19 = vld [vmem:[%s1036_s1 + $0xa0] sm:$0xff]   ;;  %v781_v23 = vld [vmem:[%s1036_s1 + $0xa8] sm:$0xff]  }
   0x9   :  { %706 = vmatpush3.bf16.msra.mxu1 %v765_v7  ;;  %v782_v24 = vld [vmem:[%s1036_s1 + $0x70] sm:$0xff]   ;;  %v786_v28 = vld [vmem:[%s1036_s1 + $0x78] sm:$0xff]   ;;  %v16_v31 = vld [vmem:[%s1035_s0] sm:$0xff] }
   0xa   :  { %707 = vmatprep.subr.bf16.mxu1 %v768_v10  ;;  %v783_v25 = vld [vmem:[%s1036_s1 + $0x30] sm:$0xff]   ;;  %v787_v29 = vld [vmem:[%s1036_s1 + $0x38] sm:$0xff]   ;;  %v624_v32 = vcombine.low %v16_v31, %v16_v31  ;;  %v625_v33 = vcombine.high %v16_v31, %v16_v31  ;;  %v792_v35 = vld [vmem:[%s1036_s1 + $0x140] sm:$0xff]  }
   0xb   :  { %686 = vmatpush3.bf16.msra.mxu0 %v767_v9  ;;  %v784_v26 = vld [vmem:[%s1036_s1 + $0xf0] sm:$0xff]   ;;  %v788_v30 = vld [vmem:[%s1036_s1 + $0xf8] sm:$0xff]   ;;  %v17_v36 = vld [vmem:[%s1035_s0 + $0x8] sm:$0xff] }
   0xc   :  { %687 = vmatprep.subr.bf16.mxu0 %v770_v12  ;;  %v785_v27 = vld [vmem:[%s1036_s1 + $0xb0] sm:$0xff]   ;;  %v791_v34 = vld [vmem:[%s1036_s1 + $0xb8] sm:$0xff]   ;;  %479 = vmatprep.mubr.bf16.mxu0 %v625_v33  ;;  %v626_v37 = vcombine.low %v17_v36, %v17_v36  ;;  %v627_v38 = vcombine.high %v17_v36, %v17_v36  ;;  %v795_v39 = vld [vmem:[%s1036_s1 + $0x100] sm:$0xff]  }
   0xd   :  { %708 = vmatpush3.bf16.msra.mxu1 %v769_v11  ;;  %v796_v40 = vld [vmem:[%s1036_s1 + $0x148] sm:$0xff]   ;;  %v798_v42 = vld [vmem:[%s1036_s1 + $0x150] sm:$0xff]   ;;  %v800_v45 = vld [vmem:[%s1036_s1 + $0x158] sm:$0xff]  }
   0xe   :  { %709 = vmatprep.subr.bf16.mxu1 %v772_v14  ;;  %519 = vmatprep.mubr.bf16.mxu1 %v627_v38  ;;  %v797_v41 = vld [vmem:[%s1036_s1 + $0x108] sm:$0xff]   ;;  %v799_v44 = vld [vmem:[%s1036_s1 + $0x110] sm:$0xff]   ;;  %v801_v46 = vld [vmem:[%s1036_s1 + $0x118] sm:$0xff]  }
   0xf   :  { %688 = vmatpush3.bf16.msra.mxu0 %v771_v13  ;;  %v802_v47 = vld [vmem:[%s1036_s1 + $0x160] sm:$0xff]   ;;  %v804_v49 = vld [vmem:[%s1036_s1 + $0x168] sm:$0xff]   ;;  %v18_v51 = vld [vmem:[%s1035_s0 + $0x10] sm:$0xff] }
  0x10   :  { %689 = vmatprep.subr.bf16.mxu0 %v774_v16  ;;  %v803_v48 = vld [vmem:[%s1036_s1 + $0x120] sm:$0xff]   ;;  %v629_v52 = vcombine.high %v18_v51, %v18_v51  ;;  %v813_v53 = vld [vmem:[%s1035_s0 + $0x18] ss:$0 sps:$4 sm:$0xff]  }
  0x11   :  { %710 = vmatpush3.bf16.msra.mxu1 %v773_v15  ;;  %v810_v50 = vld [vmem:[%s1036_s1 + $0x180] sm:$0xff]  }
  0x12   :  { %711 = vmatprep.subr.bf16.mxu1 %v776_v18 }
  0x13   :  { %690 = vmatpush3.bf16.msra.mxu0 %v775_v17 }
  0x14   :  { %691 = vmatprep.subr.bf16.mxu0 %v778_v20 }
  0x15   :  { %712 = vmatpush3.bf16.msra.mxu1 %v777_v19 }
  0x16   :  { %713 = vmatprep.subr.bf16.mxu1 %v780_v22 }
  0x17   :  { %692 = vmatpush3.bf16.msra.mxu0 %v779_v21 }
  0x18   :  { %693 = vmatprep.subr.bf16.mxu0 %v782_v24 }
  0x19   :  { %714 = vmatpush3.bf16.msra.mxu1 %v781_v23 }
  0x1a   :  { %715 = vmatprep.subr.bf16.mxu1 %v784_v26 }
  0x1b   :  { %694 = vmatpush3.bf16.msra.mxu0 %v783_v25 }
  0x1c   :  { %695 = vmatprep.subr.bf16.mxu0 %v786_v28 }
  0x1d   :  { %716 = vmatpush3.bf16.msra.mxu1 %v785_v27 }
  0x1e   :  { %717 = vmatprep.subr.bf16.mxu1 %v788_v30 }
  0x1f   :  { %696 = vmatpush3.bf16.msra.mxu0 %v787_v29 }
  0x20   :  { %725 = vmatprep.subr.bf16.mxu0 %v792_v35 }
  0x21   :  { %718 = vmatpush3.bf16.msra.mxu1 %v791_v34 }
  0x22   :  { %480 = vmatmul.mubr.bf16.vlgmr.msra.gmra.mrb[0].mxu0 %v624_v32  ;;  %749 = vmatprep.subr.bf16.mxu1 %v838_v43 }
  0x23   :  { %726 = vmatpush3.bf16.msra.mxu0 %v795_v39 }
  0x24   :  { %520 = vmatmul.mubr.bf16.vlgmr.msra.gmra.mrb[0].mxu1 %v626_v37  ;;  %727 = vmatprep.subr.bf16.mxu0 %v796_v40 }
  0x25   :  { %751 = vmatprep.mubr.msk.bf16.mxu1 %vm839_vm0, %v838_v43 }
  0x27   :  { %728 = vmatpush3.bf16.msra.mxu0 %v797_v41 }
  0x28   :  { %729 = vmatprep.subr.bf16.mxu0 %v798_v42 }
  0x2b   :  { %730 = vmatpush3.bf16.msra.mxu0 %v799_v44 }
  0x2c   :  { %731 = vmatprep.subr.bf16.mxu0 %v800_v45 }
  0x2f   :  { %732 = vmatpush3.bf16.msra.mxu0 %v801_v46 }
  0x30   :  { %733 = vmatprep.subr.bf16.mxu0 %v802_v47 }
  0x31   :  { %8 = vsyncpa [#allocation3], 0  ;;  %750 = vmatpush3.bf16.msra.mxu1 %v810_v50  ;;  %vm443_vm1 = vcmask 130048   ;;  %v805_v54 = vld [vmem:[%s1036_s1 + $0x128] sm:$0xff]   ;;  %559 = vmatprep.mubr.bf16.mxu0 %v629_v52  ;;  %v806_v55 = vld [vmem:[%s1036_s1 + $0x170] sm:$0xff]   ;;  %v628_v59 = vcombine.low %v18_v51, %v18_v51  ;;  %vm607_vm2 = vcmask 80896  }
  0x32   :  { %v807_v56 = vld [vmem:[%s1036_s1 + $0x130] sm:$0xff]   ;;  %v808_v57 = vld [vmem:[%s1036_s1 + $0x178] sm:$0xff]   ;;  %v623_v61 = vld [vmem:[%s1037_s2] ss:$0 sm:$0xff] }
  0x33   :  { %734 = vmatpush3.bf16.msra.mxu0 %v803_v48  ;;  %v809_v58 = vld [vmem:[%s1036_s1 + $0x138] sm:$0xff]   ;;  %s840_s1 = smov [#allocation2]  }
  0x34   :  { %735 = vmatprep.subr.bf16.mxu0 %v804_v49  ;;  %752 = vmatmul.mubr.msk.bf16.vlgmr.msra.gmra.mrb[4].mxu1 %vm443_vm1, %v813_v53  ;;  %s615_s2 = sshll.u32 %s840_s1, 4  ;;  %s616_s2 = int_to_ptr.vmem [resolvable:$true] %s615_s2 }
  0x35   :  { %s814_s11 = scalar_lea.vmem %s616_s2, 128  ;;  %p819_p1 = scmp.lt.s32.totalorder %s616_s2, %s616_s2 }
  0x36   :  { %p815_p0 = scmp.ne.s32.totalorder %s616_s2, %s814_s11  ;;  %p820_p2 = scmp.lt.s32.totalorder %s814_s11, %s814_s11 }
  0x37   :  { %736 = vmatpush3.bf16.msra.mxu0 %v805_v54 }
  0x38   :  { %737 = vmatprep.subr.bf16.mxu0 %v806_v55  ;;  %p821_p3 = por %p820_p2, %p819_p1 }
  0x3a   :  { %p822_p4 = pnand %p821_p3, %p815_p0 }
  0x3b   :  { %738 = vmatpush3.bf16.msra.mxu0 %v807_v56 }
  0x3c   :  { %739 = vmatprep.subr.bf16.mxu0 %v808_v57 }
  0x3f   :  { %740 = vmatpush3.bf16.msra.mxu0 %v809_v58 }
  0x42   :  { %560 = vmatmul.mubr.bf16.vlgmr.msra.gmra.mrb[4].mxu0 %v628_v59 }
  0xf5   :  { %v697_v60 = vpop.f32.mrb[0].mxu0 }
  0xf6   :  { %v698_v62 = vpop.f32.mrb[1].mxu0 }
  0xf7   :  { %v699_v63 = vadd.f32 %v698_v62, %v697_v60  ;;  %v700_v0 = vpop.f32.mrb[2].mxu0  ;;  %v719_v1 = vpop.f32.mrb[0].mxu1 }
  0xf8   :  { %v701_v2 = vpop.f32.mrb[3].mxu0  ;;  %v720_v3 = vpop.f32.mrb[1].mxu1 }
  0xf9   :  { %v482_v4 = vadd.f32 %v699_v63, %v623_v61  ;;  %v721_v5 = vadd.f32 %v720_v3, %v719_v1  ;;  %v722_v6 = vpop.f32.mrb[2].mxu1 }
  0xfa   :  { %v723_v7 = vpop.f32.mrb[3].mxu1 }
  0xfb   :  { %v522_v8 = vadd.f32 %v721_v5, %v482_v4 }
 0x107   :  { %v601_v9 = vpop.f32.mrb[4].mxu1 }
 0x108   :  { %v753_v10 = vpop.f32.mrb[5].mxu1 }
 0x109   :  { %v604_v11 = vpop.f32.mrb[6].mxu1 }
 0x10a   :  { %v754_v12 = vpop.f32.mrb[7].mxu1 }
 0x115   :  { %v741_v13 = vpop.f32.mrb[4].mxu0 }
 0x116   :  { %v742_v14 = vpop.f32.mrb[5].mxu0 }
 0x117   :  { %v743_v15 = vadd.f32 %v742_v14, %v741_v13  ;;  %v744_v16 = vpop.f32.mrb[6].mxu0 }
 0x118   :  { %v745_v17 = vpop.f32.mrb[7].mxu0 }
 0x119   :  { %v562_v18 = vadd.f32 %v743_v15, %v522_v8 }
 0x11b   :  { %v602_v19 = vadd.f32 %v601_v9, %v562_v18 }
 0x11d   :  { %608 = vst.msk [vmem:[#allocation2] sm:$0xff] %vm607_vm2, %v602_v19 }
 0x11e   :  { %825 = shalt.err (!%p822_p4)
}
 0x11f   :  { %s826_s14 = scalar_lea.hbm %s1038_s3, 128 }
 0x120   :  { %p827_p5 = scmp.ne.s32.totalorder %s1038_s3, %s826_s14  ;;  %p830_p6 = scmp.lt.u32.totalorder %s826_s14, %s1038_s3 }
 0x122   :  { %p832_p7 = pnand %p830_p6, %p827_p5 }
 0x124   :  { %835 = shalt.err (!%p832_p7)
}
 0x125   :  { %618 = dma.vmem_to_hbm [thread:$0]  %s616_s2, 128, %s1038_s3, [#allocation3]  }
 0x126   :  { %836 = dma.done.wait [#allocation3], 128  }
 0x127   :  { %837 = vsyncadd [#allocation3], 4294967168 }
 0x128   :  { %622 = vsyncpa [#allocation3], 1 }

</bundles_post_ra>
